<compile_context>
chip_gen: v7x
topology: tpu7x:2x2x1
jax: 0.10.0
libtpu: 0.0.40
codegen_flags: <defaults>
</compile_context>

<pallas_src>
import math

import jax
import jax.numpy as jnp
from jax.experimental import pallas as pl
from jax.experimental.pallas import tpu as pltpu


# ----------------------------------------------------------------------------
# Helpers
# ----------------------------------------------------------------------------
def _round_up(x, m):
    return ((x + m - 1) // m) * m


def _vmem_capacity_bytes():
    try:
        info = pltpu.get_tpu_info()
        cap = getattr(info, "vmem_capacity_bytes", None)
        if cap:
            return int(cap)
    except Exception:
        pass
    return 64 * 1024 * 1024  # conservative fallback (v7x-sized VMEM)


def _build_U(tri_vec, n):
    """U[r,c] = tri_vec[p(r,c)] for c >= r (row-major triu packing), diag exp'd.

    Vectorized gather + where construction (no XLA scatter)."""
    r = jax.lax.broadcasted_iota(jnp.int32, (n, n), 0)
    c = jax.lax.broadcasted_iota(jnp.int32, (n, n), 1)
    p = r * n - (r * (r - 1)) // 2 + (c - r)      # row-major upper-tri position
    p = jnp.clip(p, 0, tri_vec.shape[0] - 1)
    vals = jnp.take(tri_vec.astype(jnp.float32), p)
    U = jnp.where(c >= r, vals, 0.0)
    U = jnp.where(c == r, jnp.exp(U), U)
    return U


# ----------------------------------------------------------------------------
# Kernels
# ----------------------------------------------------------------------------
def _wu_kernel(ut_ref, wt_ref, cwt_ref):
    """One column-block of cw_t = U^T @ W^T  (== (W @ U)^T), canonical MXU dot."""
    cwt = jnp.dot(ut_ref[...], wt_ref[...], preferred_element_type=jnp.float32)
    cwt_ref[...] = cwt.astype(cwt_ref.dtype)


def _linear_kernel(x_ref, cwt_ref, b_ref, o_ref):
    """One (M, N) tile of y = x @ cw_t + bias, canonical (M,K)x(K,N) dot."""
    y = jnp.dot(x_ref[...], cwt_ref[...], preferred_element_type=jnp.float32)
    o_ref[...] = (y + b_ref[...]).astype(o_ref.dtype)


# ----------------------------------------------------------------------------
# Wrapper
# ----------------------------------------------------------------------------
def learnable_cov_linear(x, weight, tri_vec, bias=None):
    """x: [..., in]; weight: [out, in]; tri_vec: [in*(in+1)//2]; bias: [out]."""
    out_features, in_features = weight.shape
    dtype = x.dtype
    sz = jnp.dtype(dtype).itemsize

    # ---- glue (plain JAX, tiny one-time per call) ----------------------------
    # TODO(synk): the triangular packing itself has no clean Pallas equivalent;
    # it is O(in^2) wrapper glue feeding the kernels below.
    U = _build_U(tri_vec, in_features).astype(dtype)
    ut = U.T                                              # (in, in)

    n_pad = _round_up(out_features, 128)                  # lane-dense output / MXU N
    wt = weight.astype(dtype).T                           # (in, out)
    if n_pad != out_features:
        wt = jnp.zeros((in_features, n_pad), dtype).at[:, :out_features].set(wt)
    b = bias if bias is not None else jnp.zeros((out_features,), dtype)
    if n_pad != out_features:
        b_p = jnp.zeros((1, n_pad), dtype).at[0, :out_features].set(b.astype(dtype))
    else:
        b_p = b.astype(dtype).reshape(1, n_pad)

    # ---- generation-aware VMEM budget ----------------------------------------
    vmem_limit = min(int(_vmem_capacity_bytes() * 0.75), 100 * 1024 * 1024)
    budget = vmem_limit - 2 * 1024 * 1024                 # headroom for misc scratch

    # ---- kernel 1: cw_t = (W @ U)^T, hoisted out of the M grid ---------------
    tw = min(n_pad, 512)
    cw_t = pl.pallas_call(
        _wu_kernel,
        out_shape=jax.ShapeDtypeStruct((in_features, n_pad), dtype),
        grid_spec=pltpu.PrefetchScalarGridSpec(
            num_scalar_prefetch=0,
            grid=(pl.cdiv(n_pad, tw),),
            in_specs=[
                pl.BlockSpec((in_features, in_features), lambda j: (0, 0),
                             pipeline_mode=pl.Buffered(1)),          # U^T resident
                pl.BlockSpec((in_features, tw), lambda j: (0, j)),   # W^T col block
            ],
            out_specs=pl.BlockSpec((in_features, tw), lambda j: (0, j)),
        ),
        compiler_params=pltpu.CompilerParams(
            dimension_semantics=("parallel",),
            vmem_limit_bytes=vmem_limit,
        ),
    )(ut, wt)

    # ---- kernel 2: y = x @ cw_t + bias ----------------------------------------
    lead = x.shape[:-1]
    M = int(math.prod(lead)) if lead else 1
    x2d = x.reshape(M, in_features)
    m_ceil = _round_up(max(M, 1), 8)
    tm_cap = 1024

    # Case A: cw_t + bias resident (single-buffered), tile M only.
    resident = (in_features * n_pad + n_pad) * sz          # 1 buffer each (Buffered(1))
    per_row = 2 * (in_features + n_pad) * sz               # x + out rows, double-buffered
    tm_a = (budget - resident) // per_row if budget > resident else 0
    tm_a = (min(tm_a, tm_cap, m_ceil) // 8) * 8

    if tm_a >= min(128, m_ceil):
        tm, tn = max(8, tm_a), n_pad
    else:
        # Case B: tile N so a full-height M tile still fits (also gives both
        # v7x TensorCores independent work and bounds the resident weight slice).
        tn = min(n_pad, 512)
        fixed = 2 * tn * (in_features + 1) * sz            # cw_t + bias blocks, 2 buffers
        per_row = 2 * (in_features + tn) * sz
        tm_b = (budget - fixed) // per_row if budget > fixed else 0
        tm = max(8, (min(tm_b, tm_cap, m_ceil) // 8) * 8)
        # TODO(synk): for truly enormous in_features a K split with an f32
        # accumulator ("arbitrary" axis) would be the next step.

    grid_m = pl.cdiv(M, tm)
    grid_n = pl.cdiv(n_pad, tn)

    if grid_n == 1:
        grid = (grid_m,)
        dims = ("parallel",)
        x_spec = pl.BlockSpec((tm, in_features), lambda i: (i, 0))
        cw_spec = pl.BlockSpec((in_features, n_pad), lambda i: (0, 0),
                               pipeline_mode=pl.Buffered(1))         # resident
        b_spec = pl.BlockSpec((1, n_pad), lambda i: (0, 0),
                              pipeline_mode=pl.Buffered(1))          # resident
        o_spec = pl.BlockSpec((tm, n_pad), lambda i: (i, 0))
    else:
        grid = (grid_n, grid_m)            # N outer (weight slice held), M inner
        dims = ("parallel", "parallel")
        x_spec = pl.BlockSpec((tm, in_features), lambda j, i: (i, 0))
        cw_spec = pl.BlockSpec((in_features, tn), lambda j, i: (0, j))
        b_spec = pl.BlockSpec((1, tn), lambda j, i: (0, j))
        o_spec = pl.BlockSpec((tm, tn), lambda j, i: (i, j))

    out = pl.pallas_call(
        _linear_kernel,
        out_shape=jax.ShapeDtypeStruct((M, n_pad), dtype),
        grid_spec=pltpu.PrefetchScalarGridSpec(
            num_scalar_prefetch=0,
            grid=grid,
            in_specs=[x_spec, cw_spec, b_spec],
            out_specs=o_spec,
        ),
        compiler_params=pltpu.CompilerParams(
            dimension_semantics=dims,
            vmem_limit_bytes=vmem_limit,
        ),
    )(x2d, cw_t, b_p)

    if n_pad != out_features:
        out = out[:, :out_features]
    return out.reshape(*lead, out_features)


# ----------------------------------------------------------------------------
# Parameter init mirroring the module
# ----------------------------------------------------------------------------
def init_params(key, in_features, out_features, dtype=jnp.float32):
    k_w, k_b, k_t = jax.random.split(key, 3)
    # kaiming_normal_(a=sqrt(5)): gain = sqrt(2 / (1 + 5)), std = gain / sqrt(fan_in)
    fan_in = in_features
    gain = math.sqrt(2.0 / (1.0 + 5.0))
    std = gain / math.sqrt(fan_in)
    weight = std * jax.random.normal(k_w, (out_features, in_features), dtype=dtype)
    bound = 1.0 / math.sqrt(fan_in)
    bias = jax.random.uniform(k_b, (out_features,), dtype=dtype,
                              minval=-bound, maxval=bound)
    # Module inits tri_vec to 0 (U == identity); use small random values so the
    # U-construction path is actually exercised.
    triu_len = (in_features * (in_features + 1)) // 2
    tri_vec = 0.01 * jax.random.normal(k_t, (triu_len,), dtype=dtype)
    return weight, tri_vec, bias


def _reference(x, weight, tri_vec, bias):
    # Scatter-based reference (independent of the gather construction above).
    in_features = weight.shape[1]
    rows, cols = jnp.triu_indices(in_features)
    U = jnp.zeros((in_features, in_features), jnp.float32)
    U = U.at[rows, cols].set(tri_vec.astype(jnp.float32))
    idx = jnp.arange(in_features)
    U = U.at[idx, idx].set(jnp.exp(U[idx, idx]))
    cw = weight.astype(jnp.float32) @ U
    return (x.astype(jnp.float32) @ cw.T + bias.astype(jnp.float32)).astype(x.dtype)


if __name__ == "__main__":
    in_features = 32
    out_features = 32
    batch, seq = 2, 8

    key = jax.random.PRNGKey(0)
    k_x, k_p = jax.random.split(key)
    x = jax.random.normal(k_x, (batch, seq, in_features), dtype=jnp.float32)
    weight, tri_vec, bias = init_params(k_p, in_features, out_features)

    y = learnable_cov_linear(x, weight, tri_vec, bias)
    y = jax.block_until_ready(y)

    y_ref = _reference(x, weight, tri_vec, bias)
    assert y.shape == (batch, seq, out_features)
    assert jnp.allclose(y, y_ref, atol=1e-4, rtol=1e-4), "mismatch vs reference"

    print("KERNEL_OK")
</pallas_src>

<mosaic_0001>
module attributes {stable_mosaic.version = 11 : i64} {
  func.func @_wu_kernel(%arg0: i32, %arg1: memref<32x32xf32, #tpu.memory_space<vmem>>, %arg2: memref<32x128xf32, #tpu.memory_space<vmem>>, %arg3: memref<32x128xf32, #tpu.memory_space<vmem>>) attributes {dimension_semantics = [#tpu.dimension_semantics<parallel>], iteration_bounds = array<i64: 1>, scalar_prefetch = 0 : i64, scratch_operands = 0 : i64, tpu.core_type = #tpu.core_type<tc>, window_params = [{pipeline_mode = #tpu.pipeline_mode<synchronous>, transform_indices = @transform_0, window_bounds = array<i64: 32, 32>}, {transform_indices = @transform_1, window_bounds = array<i64: 32, 128>}, {transform_indices = @transform_2, window_bounds = array<i64: 32, 128>}]} {
    %c0 = arith.constant 0 : index
    %c0_0 = arith.constant 0 : index
    %0 = vector.load %arg1[%c0, %c0_0] : memref<32x32xf32, #tpu.memory_space<vmem>>, vector<32x32xf32>
    %c0_1 = arith.constant 0 : index
    %c0_2 = arith.constant 0 : index
    %1 = vector.load %arg2[%c0_1, %c0_2] : memref<32x128xf32, #tpu.memory_space<vmem>>, vector<32x128xf32>
    %cst = arith.constant dense<0.000000e+00> : vector<32x128xf32>
    %2 = tpu.matmul %0, %1, %cst {dimension_numbers = #tpu.dot_dimension_numbers<[1], [0], [0], [1], [0, 0, 1, 1], [], []>} : vector<32x32xf32>, vector<32x128xf32>, vector<32x128xf32> -> vector<32x128xf32>
    %c0_3 = arith.constant 0 : index
    %c0_4 = arith.constant 0 : index
    %3 = vector.load %arg3[%c0_3, %c0_4] : memref<32x128xf32, #tpu.memory_space<vmem>>, vector<32x128xf32>
    tpu.vector_store %arg3[%c0_3, %c0_4], %2 {strides = array<i32>} : memref<32x128xf32, #tpu.memory_space<vmem>>, vector<32x128xf32>,
    return
  }
  func.func @transform_0(%arg0: i32) -> (i32, i32) {
    %c0_i32 = arith.constant 0 : i32
    %c0_i32_0 = arith.constant 0 : i32
    %c0_i32_1 = arith.constant 0 : i32
    return %c0_i32, %c0_i32_0 : i32, i32
  }
  func.func @transform_1(%arg0: i32) -> (i32, i32) {
    %c0_i32 = arith.constant 0 : i32
    %c0_i32_0 = arith.constant 0 : i32
    return %c0_i32, %arg0 : i32, i32
  }
  func.func @transform_2(%arg0: i32) -> (i32, i32) {
    %c0_i32 = arith.constant 0 : i32
    %c0_i32_0 = arith.constant 0 : i32
    return %c0_i32, %arg0 : i32, i32
  }
}

</mosaic_0001>

<bundles_post_ra>
// kernel: tpu_custom_call.1
= control target key start
LH: loop header
LB: loop body
LE: loop exit
PB: predicated region body
PF: predicated region fallthrough
CT: control target
= control target key end

     0   :  { %7 = vsyncpa [#allocation3], 0  ;;  %s352_s0 = inlined_call_operand.hbm [shape: f32[32,32], index: 0, kind: input, shape index: {}]   ;;  %s353_s1 = inlined_call_operand.hbm [shape: f32[32,128], index: 1, kind: input, shape index: {}]   ;;  %s354_s2 = inlined_call_operand.hbm [shape: f32[32,128], index: 2, kind: output, shape index: {}]  }
   0x1   :  { %8 = vsyncpa [#allocation6], 0 }
   0x2   :  { %9 = vsyncpa [#allocation4], 0  ;;  %s283_s9 = smov [#allocation2]   ;;  %s211_s13 = scalar_lea.hbm %s352_s0, 512 }
   0x3   :  { %s15_s10 = sshll.u32 %s283_s9, 4  ;;  %p212_p0 = scmp.ne.s32.totalorder %s352_s0, %s211_s13  ;;  %s16_s10 = int_to_ptr.vmem [resolvable:$true] %s15_s10 }
   0x4   :  { %p215_p1 = scmp.lt.u32.totalorder %s211_s13, %s352_s0 }
   0x6   :  { %p217_p2 = pnand %p215_p1, %p212_p0 }
   0x8   :  { %220 = shalt.err (!%p217_p2)
}
   0x9   :  { %s221_s18 = scalar_lea.vmem %s16_s10, 512  ;;  %p226_p4 = scmp.lt.s32.totalorder %s16_s10, %s16_s10 }
   0xa   :  { %p222_p3 = scmp.ne.s32.totalorder %s16_s10, %s221_s18  ;;  %p227_p5 = scmp.lt.s32.totalorder %s221_s18, %s221_s18 }
   0xc   :  { %p228_p6 = por %p227_p5, %p226_p4 }
   0xe   :  { %p229_p7 = pnand %p228_p6, %p222_p3 }
  0x10   :  { %232 = shalt.err (!%p229_p7)
}
  0x11   :  { %s284_s19 = smov 128   ;;  %s285_s20 = smov 8  }
  0x12   :  { %21 = dma.hbm_to_vmem [thread:$0]  %s352_s0, 512, %s16_s10, [#allocation3], %s284_s19, %s284_s19, %s285_s20  }
  0x13   :  { %s286_s23 = smov [#allocation5]   ;;  %s233_s27 = scalar_lea.hbm %s353_s1, 512 }
  0x14   :  { %s27_s24 = sshll.u32 %s286_s23, 4  ;;  %p234_p8 = scmp.ne.s32.totalorder %s353_s1, %s233_s27  ;;  %s28_s24 = int_to_ptr.vmem [resolvable:$true] %s27_s24 }
  0x15   :  { %p237_p9 = scmp.lt.u32.totalorder %s233_s27, %s353_s1 }
  0x17   :  { %p239_p10 = pnand %p237_p9, %p234_p8 }
  0x19   :  { %242 = shalt.err (!%p239_p10)
}
  0x1a   :  { %s243_s4 = scalar_lea.vmem %s28_s24, 512  ;;  %p248_p12 = scmp.lt.s32.totalorder %s28_s24, %s28_s24 }
  0x1b   :  { %p244_p11 = scmp.ne.s32.totalorder %s28_s24, %s243_s4  ;;  %p249_p13 = scmp.lt.s32.totalorder %s243_s4, %s243_s4 }
  0x1d   :  { %p250_p0 = por %p249_p13, %p248_p12 }
  0x1f   :  { %p251_p1 = pnand %p250_p0, %p244_p11 }
  0x21   :  { %254 = shalt.err (!%p251_p1)
}
  0x22   :  { %33 = dma.hbm_to_vmem [thread:$0]  %s353_s1, 512, %s28_s24, [#allocation6], %s284_s19, %s284_s19, %s285_s20  }
  0x23   :  { %277 = dma.done.wait [#allocation3], 512  }
  0x24   :  { %278 = vsyncadd [#allocation3], 4294966784 }
  0x25   :  { %279 = dma.done.wait [#allocation6], 512  }
  0x26   :  { %280 = vsyncadd [#allocation6], 4294966784  ;;  %vm48_vm0 = vcmask 261120   ;;  %v44_v0 = vld [vmem:[#allocation5] sm:$0xff]  ;;  %v45_v1 = vld [vmem:[#allocation5 + $0x8] sm:$0xff]  ;;  %s287_s1 = smov [#allocation7]  }
  0x27   :  { %v46_v2 = vld [vmem:[#allocation5 + $0x10] sm:$0xff]  ;;  %v194_v3 = vpack.c.bf16 %v45_v1, %v44_v0  ;;  %v47_v4 = vld [vmem:[#allocation5 + $0x18] sm:$0xff]  ;;  %v40_v5 = vld [vmem:[#allocation2] sm:$0xff]  ;;  %s155_s6 = sshll.u32 %s287_s1, 4  ;;  %s156_s6 = int_to_ptr.vmem [resolvable:$true] %s155_s6 }
  0x28   :  { %v42_v6 = vld [vmem:[#allocation2 + $0x10] sm:$0xff]  ;;  %v198_v7 = vpack.c.bf16 %v47_v4, %v46_v2  ;;  %188 = vmatprep.mubr.msk.f32.mxu0 %vm48_vm0, %v40_v5  ;;  %v41_v8 = vld [vmem:[#allocation2 + $0x8] sm:$0xff]  ;;  %v43_v9 = vld [vmem:[#allocation2 + $0x18] sm:$0xff]  ;;  %s255_s7 = scalar_lea.vmem %s156_s6, 512  ;;  %p260_p3 = scmp.lt.s32.totalorder %s156_s6, %s156_s6 }
  0x29   :  { %191 = vmatprep.mubr.msk.f32.mxu1 %vm48_vm0, %v42_v6  ;;  %195 = vmatprep.subr.bf16.mxu0 %v194_v3  ;;  %p256_p2 = scmp.ne.s32.totalorder %s156_s6, %s255_s7  ;;  %p261_p4 = scmp.lt.s32.totalorder %s255_s7, %s255_s7 }
  0x2a   :  { %202 = vmatprep.subr.bf16.mxu1 %v194_v3  ;;  %197 = vmatpush3.bf16.msra.mxu0 %v194_v3 }
  0x2b   :  { %204 = vmatpush3.bf16.msra.mxu1 %v194_v3  ;;  %199 = vmatprep.subr.bf16.mxu0 %v198_v7  ;;  %p262_p5 = por %p261_p4, %p260_p3 }
  0x2c   :  { %203 = vmatprep.subr.bf16.mxu1 %v198_v7 }
  0x2d   :  { %p263_p6 = pnand %p262_p5, %p256_p2 }
  0x2e   :  { %201 = vmatpush3.bf16.msra.mxu0 %v198_v7 }
  0x2f   :  { %205 = vmatpush3.bf16.msra.mxu1 %v198_v7 }
  0x31   :  { %189 = vmatmul.mubr.msk.f32.vlgmr.msra.gmra.mrb[0].mxu0 %vm48_vm0, %v41_v8 }
  0x32   :  { %192 = vmatmul.mubr.msk.f32.vlgmr.msra.gmra.mrb[0].mxu1 %vm48_vm0, %v43_v9 }
 0x104   :  { %v190_v10 = vpop.f32.mrb[0].mxu0 }
 0x105   :  { %v193_v11 = vpop.f32.mrb[0].mxu1  ;;  %147 = vst [vmem:[#allocation7 + $0x8] sm:$0xff] %v190_v10  ;;  %v127_v12 = vpop.f32.mrb[1].mxu0 }
 0x106   :  { %149 = vst [vmem:[#allocation7 + $0x18] sm:$0xff] %v193_v11  ;;  %v137_v13 = vpop.f32.mrb[1].mxu1  ;;  %146 = vst [vmem:[#allocation7] sm:$0xff] %v127_v12 }
 0x107   :  { %148 = vst [vmem:[#allocation7 + $0x10] sm:$0xff] %v137_v13 }
 0x108   :  { %266 = shalt.err (!%p263_p6)
}
 0x109   :  { %s267_s10 = scalar_lea.hbm %s354_s2, 512 }
 0x10a   :  { %p268_p7 = scmp.ne.s32.totalorder %s354_s2, %s267_s10  ;;  %p271_p8 = scmp.lt.u32.totalorder %s267_s10, %s354_s2 }
 0x10c   :  { %p273_p9 = pnand %p271_p8, %p268_p7 }
 0x10e   :  { %276 = shalt.err (!%p273_p9)
}
 0x10f   :  { %161 = dma.vmem_to_hbm [thread:$0]  %s156_s6, 512, %s354_s2, [#allocation4], %s284_s19, %s284_s19, %s285_s20  }
 0x110   :  { %281 = dma.done.wait [#allocation4], 512  }
 0x111   :  { %282 = vsyncadd [#allocation4], 4294966784 }
 0x112   :  { %165 = vsyncpa [#allocation3], 1 }
 0x113   :  { %166 = vsyncpa [#allocation6], 1 }
 0x114   :  { %167 = vsyncpa [#allocation4], 1 }

</bundles_post_ra>
